<compile_context>
chip_gen: v6e
topology: v6e:2x2x1
jax: 0.10.0
libtpu: 0.0.40
codegen_flags: <defaults>
</compile_context>

<pallas_src>
import functools
import numpy as np

import jax
import jax.numpy as jnp
from jax.experimental import pallas as pl
from jax.experimental.pallas import tpu as pltpu


def _padding(downsample, kernel_size):
    """Compute required padding (same formula as the PyTorch module)."""
    return max(0, int(np.floor((kernel_size - downsample + 1) / 2)))


# ----------------------------------------------------------------------------
# Fused kernel: conv1 + BN1 + ReLU  ->  conv2 (strided) + skip + BN2 + ReLU.
# One grid step = `bt` batch elements; all conv taps are pre-folded (grouped /
# polyphase) into the contraction dimension, so every tap is one contiguous
# bf16 MXU matmul with f32 accumulation.
# ----------------------------------------------------------------------------
def _resblock_fused_kernel(xg_ref, yp_ref, w1g_ref, w2g_ref, *rest,
                           bt, lout, top, q1, q2, hg, chunk, identity_skip):
    # xg_ref : (bt, ngx, d*Cin)    bf16 grouped, zero-padded input
    # yp_ref : (bt, Lout, Cin)     pooled skip input (bf16 or f32)
    # w1g_ref: (q1, d*Cin, d*Cout) bf16 grouped conv1 weights
    # w2g_ref: (q2, d*Cout, Cout)  bf16 grouped conv2 weights
    # wsk    : (Cin, Cout)         bf16 1x1 skip conv (only when not identity)
    # sc/bi  : (1, d*Cout)/(1, Cout) f32 folded BN scale / bias
    # x_out  : (bt, Lout, Cout)    f32 post BN2 + ReLU
    # y_out  : (bt, Lout, Cout)    f32 residual sum before BN2
    # hbuf   : (hg, d*Cout)        bf16 grouped intermediate h (VMEM scratch)
    if identity_skip:
        (sc1_ref, bi1_ref, sc2_ref, bi2_ref,
         x_out_ref, y_out_ref, hbuf) = rest
        wsk_ref = None
    else:
        (wsk_ref, sc1_ref, bi1_ref, sc2_ref, bi2_ref,
         x_out_ref, y_out_ref, hbuf) = rest

    gcout = hbuf.shape[1]          # d * Cout (grouped channel width)
    cout = x_out_ref.shape[2]

    # Zero the halo rows of the grouped-h scratch (they represent h positions
    # outside [0, L), which must contribute 0 to conv2).
    if top > 0:
        hbuf[pl.ds(0, top), :] = jnp.zeros((top, gcout), hbuf.dtype)
    tail = hg - (top + lout)
    if tail > 0:
        hbuf[pl.ds(top + lout, tail), :] = jnp.zeros((tail, gcout), hbuf.dtype)

    offs = [(o, min(chunk, lout - o)) for o in range(0, lout, chunk)]

    for b in range(bt):
        # ---- conv1 (grouped taps) + BN1 + ReLU, chunked over rows ----------
        for off, n in offs:
            acc = jnp.zeros((n, gcout), jnp.float32)
            for q in range(q1):
                acc += jnp.dot(xg_ref[b, pl.ds(off + q, n), :], w1g_ref[q],
                               preferred_element_type=jnp.float32)
            hblk = jnp.maximum(acc * sc1_ref[...] + bi1_ref[...], 0.0)
            hbuf[pl.ds(top + off, n), :] = hblk.astype(hbuf.dtype)

        # ---- conv2 (grouped taps, stride folded) + skip + BN2 + ReLU -------
        for off, n in offs:
            acc = jnp.zeros((n, cout), jnp.float32)
            for q in range(q2):
                acc += jnp.dot(hbuf[pl.ds(off + q, n), :], w2g_ref[q],
                               preferred_element_type=jnp.float32)
            ysk = yp_ref[b, pl.ds(off, n), :]
            if identity_skip:
                ysk = ysk.astype(jnp.float32)
            else:
                ysk = jnp.dot(ysk, wsk_ref[...],
                              preferred_element_type=jnp.float32)
            s = acc + ysk
            y_out_ref[b, pl.ds(off, n), :] = s
            x_out_ref[b, pl.ds(off, n), :] = jnp.maximum(
                s * sc2_ref[...] + bi2_ref[...], 0.0)


# ----------------------------------------------------------------------------
# Module wrapper
# ----------------------------------------------------------------------------
class ResBlock1dPallas:
    def __init__(self, n_filters_in, n_filters_out, downsample, kernel_size,
                 dropout_rate, key):
        if kernel_size % 2 == 0:
            raise ValueError("kernel_size must be odd")
        self.cin = n_filters_in
        self.cout = n_filters_out
        self.d = downsample
        self.k = kernel_size
        self.dropout_rate = dropout_rate   # identity in inference mode
        self.identity_skip = (n_filters_in == n_filters_out)

        d, K, cin, cout = downsample, kernel_size, n_filters_in, n_filters_out
        self.p1 = _padding(1, K)
        self.p2 = _padding(d, K)
        self.shift2 = (-self.p2) % d                   # align h to a multiple of d
        self.top = (self.p2 + self.shift2) // d        # leading halo rows in hbuf
        self.q1 = (K - 1 + d - 1) // d + 1             # grouped conv1 taps
        self.q2 = (K - 1 + self.shift2) // d + 1       # grouped conv2 taps

        ks = jax.random.split(key, 12)
        w1_oik = 0.1 * jax.random.normal(ks[0], (cout, cin, K), jnp.float32)
        w2_oik = 0.1 * jax.random.normal(ks[1], (cout, cout, K), jnp.float32)
        w1_kio = np.asarray(jnp.transpose(w1_oik, (2, 1, 0)))   # (K, Cin, Cout)
        w2_kio = np.asarray(jnp.transpose(w2_oik, (2, 1, 0)))   # (K, Cout, Cout)
        # Per-tap weights (bf16) kept for the pure-JAX reference.
        self.w1 = jnp.asarray(w1_kio, jnp.bfloat16)
        self.w2 = jnp.asarray(w2_kio, jnp.bfloat16)

        # Grouped conv1 weights: (q1, d*Cin, d*Cout)
        #   [q, ph*Cin:(ph+1)*Cin, r*Cout:(r+1)*Cout] = w1[k], k = q*d + ph - r
        w1g = np.zeros((self.q1, d * cin, d * cout), np.float32)
        for q in range(self.q1):
            for ph in range(d):
                for r in range(d):
                    k = q * d + ph - r
                    if 0 <= k < K:
                        w1g[q, ph * cin:(ph + 1) * cin,
                            r * cout:(r + 1) * cout] = w1_kio[k]
        # Grouped conv2 weights: (q2, d*Cout, Cout)
        #   [q, ph*Cout:(ph+1)*Cout, :] = w2[k], k = q*d + ph - shift2
        w2g = np.zeros((self.q2, d * cout, cout), np.float32)
        for q in range(self.q2):
            for ph in range(d):
                k = q * d + ph - self.shift2
                if 0 <= k < K:
                    w2g[q, ph * cout:(ph + 1) * cout, :] = w2_kio[k]
        self.w1g = jnp.asarray(w1g, jnp.bfloat16)
        self.w2g = jnp.asarray(w2g, jnp.bfloat16)

        if not self.identity_skip:
            w1x1 = 0.1 * jax.random.normal(ks[2], (cout, cin), jnp.float32)
            self.wsk = jnp.transpose(w1x1, (1, 0)).astype(jnp.bfloat16)  # (Cin, Cout)
        else:
            self.wsk = None   # identity skip: no 1x1 matmul at all

        def bn_params(kg, kb, km, kv):
            gamma = 1.0 + 0.1 * jax.random.normal(kg, (cout,), jnp.float32)
            beta = 0.1 * jax.random.normal(kb, (cout,), jnp.float32)
            mean = 0.1 * jax.random.normal(km, (cout,), jnp.float32)
            var = jax.random.uniform(kv, (cout,), jnp.float32, 0.5, 1.5)
            scale = gamma / jnp.sqrt(var + 1e-5)
            bias = beta - mean * scale
            return scale.reshape(1, -1), bias.reshape(1, -1)

        self.scale1, self.bias1 = bn_params(ks[3], ks[4], ks[5], ks[6])
        self.scale2, self.bias2 = bn_params(ks[7], ks[8], ks[9], ks[10])
        # BN1 scale/bias tiled to the grouped (d*Cout) layout.
        self.scale1t = jnp.tile(self.scale1, (1, d))
        self.bias1t = jnp.tile(self.bias1, (1, d))

    def __call__(self, x_ncl, y_ncl):
        N, Cin, L = x_ncl.shape
        assert Cin == self.cin
        Cout, K, d = self.cout, self.k, self.d
        p1, p2 = self.p1, self.p2
        assert L % d == 0
        Lout = (L + 2 * p2 - K) // d + 1
        assert Lout == L // d, "conv2 and maxpool output lengths must match"
        gcin, gcout = d * Cin, d * Cout
        q1, q2, top = self.q1, self.q2, self.top
        ngx = Lout + q1 - 1                       # grouped-x rows per sample
        hg = max(Lout + q2 - 1, top + Lout)       # grouped-h scratch rows

        # Wrapper glue (one fused XLA op each, no in-kernel relayout):
        #   * NCL->NLC transpose fused with the bf16 cast, zero-pad by p1
        #     (conv1 halo), reshape to grouped (ngx, d*Cin) layout.
        #   * skip-path MaxPool fused with its transpose; bf16 on the 1x1 path.
        x = jnp.transpose(x_ncl, (0, 2, 1)).astype(jnp.bfloat16)   # (N, L, Cin)
        pad_back = d * ngx - p1 - L
        xg = jnp.pad(x, ((0, 0), (p1, pad_back), (0, 0))).reshape(N, ngx, gcin)

        y = jnp.transpose(y_ncl, (0, 2, 1))                        # (N, L, Cin) f32
        if d > 1:
            yp = jnp.max(y[:, :Lout * d, :].reshape(N, Lout, d, Cin), axis=2)
        else:
            yp = y
        if not self.identity_skip:
            yp = yp.astype(jnp.bfloat16)   # feeds a bf16 MXU matmul anyway

        # Batch tile: several samples per grid step for small problems.
        bt = 1
        for cand in range(min(N, max(1, 512 // max(Lout, 1))), 0, -1):
            if N % cand == 0:
                bt = cand
                break
        chunk = min(128, Lout)             # in-kernel L tile (grouped rows)

        in_arrays = [xg, yp, self.w1g, self.w2g]
        in_specs = [
            pl.BlockSpec((bt, ngx, gcin), lambda n: (n, 0, 0)),
            pl.BlockSpec((bt, Lout, Cin), lambda n: (n, 0, 0)),
            pl.BlockSpec((q1, gcin, gcout), lambda n: (0, 0, 0)),
            pl.BlockSpec((q2, gcout, Cout), lambda n: (0, 0, 0)),
        ]
        if not self.identity_skip:
            in_arrays.append(self.wsk)
            in_specs.append(pl.BlockSpec((Cin, Cout), lambda n: (0, 0)))
        in_arrays += [self.scale1t, self.bias1t, self.scale2, self.bias2]
        in_specs += [pl.BlockSpec((1, gcout), lambda n: (0, 0)),
                     pl.BlockSpec((1, gcout), lambda n: (0, 0)),
                     pl.BlockSpec((1, Cout), lambda n: (0, 0)),
                     pl.BlockSpec((1, Cout), lambda n: (0, 0))]

        # Explicit scoped-VMEM budget from the actual tile sizes (+headroom).
        def nbytes(shape, dt):
            return int(np.prod(shape)) * jnp.dtype(dt).itemsize
        est = 2 * (bt * nbytes((ngx, gcin), jnp.bfloat16)
                   + bt * nbytes((Lout, Cin), yp.dtype)
                   + nbytes((q1, gcin, gcout), jnp.bfloat16)
                   + nbytes((q2, gcout, Cout), jnp.bfloat16)
                   + (0 if self.identity_skip else nbytes((Cin, Cout), jnp.bfloat16))
                   + 2 * bt * nbytes((Lout, Cout), jnp.float32)) \
            + nbytes((hg, gcout), jnp.bfloat16) + 4 * chunk * gcout
        vmem_limit = int(min(max(4 * est, 16 << 20), 64 << 20))

        kern = functools.partial(
            _resblock_fused_kernel, bt=bt, lout=Lout, top=top, q1=q1, q2=q2,
            hg=hg, chunk=chunk, identity_skip=self.identity_skip)

        x_out, y_out = pl.pallas_call(
            kern,
            out_shape=(jax.ShapeDtypeStruct((N, Lout, Cout), jnp.float32),
                       jax.ShapeDtypeStruct((N, Lout, Cout), jnp.float32)),
            grid=(N // bt,),
            in_specs=in_specs,
            out_specs=(pl.BlockSpec((bt, Lout, Cout), lambda n: (n, 0, 0)),
                       pl.BlockSpec((bt, Lout, Cout), lambda n: (n, 0, 0))),
            scratch_shapes=[pltpu.VMEM((hg, gcout), jnp.bfloat16)],
            compiler_params=pltpu.CompilerParams(
                dimension_semantics=("parallel",),
                vmem_limit_bytes=vmem_limit),
        )(*in_arrays)

        # back to PyTorch NCL layout
        return jnp.transpose(x_out, (0, 2, 1)), jnp.transpose(y_out, (0, 2, 1))


# ----------------------------------------------------------------------------
# Pure-JAX reference (lax.conv, mirroring the bf16-operand / f32-accum math)
# ----------------------------------------------------------------------------
def _reference(block, x, y):
    d, K = block.d, block.k
    p1, p2 = _padding(1, K), _padding(d, K)
    dn = ("NCH", "OIH", "NCH")
    w1 = jnp.transpose(block.w1, (2, 1, 0))   # bf16, OIK
    w2 = jnp.transpose(block.w2, (2, 1, 0))

    def bn(v, scale, bias):
        return v * scale.reshape(1, -1, 1) + bias.reshape(1, -1, 1)

    # skip connection: maxpool (f32) then optional 1x1 conv (bf16 operands)
    ys = y
    if d > 1:
        N, C, L = y.shape
        ys = jnp.max(y[:, :, :(L // d) * d].reshape(N, C, L // d, d), axis=-1)
    if not block.identity_skip:
        w1x1 = jnp.transpose(block.wsk, (1, 0))[:, :, None]   # (Cout, Cin, 1) bf16
        ys = jax.lax.conv_general_dilated(
            ys.astype(jnp.bfloat16), w1x1, (1,), [(0, 0)], dimension_numbers=dn,
            preferred_element_type=jnp.float32)

    h = jax.lax.conv_general_dilated(
        x.astype(jnp.bfloat16), w1, (1,), [(p1, p1)], dimension_numbers=dn,
        preferred_element_type=jnp.float32)
    h = jnp.maximum(bn(h, block.scale1, block.bias1), 0.0)
    c2 = jax.lax.conv_general_dilated(
        h.astype(jnp.bfloat16), w2, (d,), [(p2, p2)], dimension_numbers=dn,
        preferred_element_type=jnp.float32)
    s = c2 + ys
    xo = jnp.maximum(bn(s, block.scale2, block.bias2), 0.0)
    return xo, s


def _run_and_check(N, Cin, Cout, L, downsample, kernel_size, key):
    kx, ky, kp = jax.random.split(key, 3)
    block = ResBlock1dPallas(Cin, Cout, downsample, kernel_size, 0.2, key=kp)
    x = jax.random.normal(kx, (N, Cin, L), jnp.float32)
    y = jax.random.normal(ky, (N, Cin, L), jnp.float32)

    x_out, y_out = block(x, y)
    jax.block_until_ready((x_out, y_out))

    x_ref, y_ref = _reference(block, x, y)
    Lout = L // downsample
    assert x_out.shape == (N, Cout, Lout)
    assert y_out.shape == (N, Cout, Lout)
    err_x = float(jnp.max(jnp.abs(x_out - x_ref)))
    err_y = float(jnp.max(jnp.abs(y_out - y_ref)))
    assert err_x < 2e-2 and err_y < 2e-2, (err_x, err_y)


if __name__ == "__main__":
    key = jax.random.PRNGKey(0)
    k1, k2, k3 = jax.random.split(key, 3)

    # Config A: channel expansion + downsample (1x1 skip conv + maxpool path)
    _run_and_check(N=2, Cin=4, Cout=8, L=16, downsample=2, kernel_size=3, key=k1)
    # Config B: identity skip, no downsample (skip_connection is None in PyTorch)
    _run_and_check(N=2, Cin=8, Cout=8, L=16, downsample=1, kernel_size=3, key=k2)
    # Config C: larger downsample / kernel; exercises grouped taps, multi-chunk
    # in-kernel L tiling and the batch-tiled grid step.
    _run_and_check(N=2, Cin=8, Cout=16, L=1024, downsample=4, kernel_size=5, key=k3)

    print("KERNEL_OK")
</pallas_src>

<mosaic_0001>
module attributes {stable_mosaic.version = 11 : i64} {
  func.func @_resblock_fused_kernel(%arg0: i32, %arg1: memref<2x9x8xbf16, #tpu.memory_space<vmem>>, %arg2: memref<2x8x4xbf16, #tpu.memory_space<vmem>>, %arg3: memref<2x8x16xbf16, #tpu.memory_space<vmem>>, %arg4: memref<2x16x8xbf16, #tpu.memory_space<vmem>>, %arg5: memref<4x8xbf16, #tpu.memory_space<vmem>>, %arg6: memref<1x16xf32, #tpu.memory_space<vmem>>, %arg7: memref<1x16xf32, #tpu.memory_space<vmem>>, %arg8: memref<1x8xf32, #tpu.memory_space<vmem>>, %arg9: memref<1x8xf32, #tpu.memory_space<vmem>>, %arg10: memref<2x8x8xf32, #tpu.memory_space<vmem>>, %arg11: memref<2x8x8xf32, #tpu.memory_space<vmem>>, %arg12: memref<9x16xbf16, #tpu.memory_space<vmem>>) attributes {dimension_semantics = [#tpu.dimension_semantics<parallel>], iteration_bounds = array<i64: 1>, scalar_prefetch = 0 : i64, scratch_operands = 1 : i64, tpu.core_type = #tpu.core_type<tc>, window_params = [{transform_indices = @transform_0, window_bounds = array<i64: 2, 9, 8>}, {transform_indices = @transform_1, window_bounds = array<i64: 2, 8, 4>}, {pipeline_mode = #tpu.pipeline_mode<synchronous>, transform_indices = @transform_2, window_bounds = array<i64: 2, 8, 16>}, {pipeline_mode = #tpu.pipeline_mode<synchronous>, transform_indices = @transform_3, window_bounds = array<i64: 2, 16, 8>}, {pipeline_mode = #tpu.pipeline_mode<synchronous>, transform_indices = @transform_4, window_bounds = array<i64: 4, 8>}, {pipeline_mode = #tpu.pipeline_mode<synchronous>, transform_indices = @transform_5, window_bounds = array<i64: 1, 16>}, {pipeline_mode = #tpu.pipeline_mode<synchronous>, transform_indices = @transform_6, window_bounds = array<i64: 1, 16>}, {pipeline_mode = #tpu.pipeline_mode<synchronous>, transform_indices = @transform_7, window_bounds = array<i64: 1, 8>}, {pipeline_mode = #tpu.pipeline_mode<synchronous>, transform_indices = @transform_8, window_bounds = array<i64: 1, 8>}, {transform_indices = @transform_9, window_bounds = array<i64: 2, 8, 8>}, {transform_indices = @transform_10, window_bounds = array<i64: 2, 8, 8>}]} {
    %cst = arith.constant 0.000000e+00 : bf16
    %0 = vector.broadcast %cst : bf16 to vector<1x16xbf16>
    %c0 = arith.constant 0 : index
    %c0_0 = arith.constant 0 : index
    %1 = vector.load %arg12[%c0, %c0_0] : memref<9x16xbf16, #tpu.memory_space<vmem>>, vector<1x16xbf16>
    tpu.vector_store %arg12[%c0, %c0_0], %0 {strides = array<i32>} : memref<9x16xbf16, #tpu.memory_space<vmem>>, vector<1x16xbf16>,
    %cst_1 = arith.constant 0.000000e+00 : f32
    %2 = vector.broadcast %cst_1 : f32 to vector<8x16xf32>
    %c0_2 = arith.constant 0 : index
    %c0_3 = arith.constant 0 : index
    %c0_4 = arith.constant 0 : index
    %3 = vector.load %arg1[%c0_2, %c0_3, %c0_4] : memref<2x9x8xbf16, #tpu.memory_space<vmem>>, vector<1x8x8xbf16>
    %4 = vector.shape_cast %3 : vector<1x8x8xbf16> to vector<8x8xbf16>
    %c0_5 = arith.constant 0 : index
    %c0_6 = arith.constant 0 : index
    %c0_7 = arith.constant 0 : index
    %5 = vector.load %arg3[%c0_5, %c0_6, %c0_7] : memref<2x8x16xbf16, #tpu.memory_space<vmem>>, vector<1x8x16xbf16>
    %6 = vector.shape_cast %5 : vector<1x8x16xbf16> to vector<8x16xbf16>
    %cst_8 = arith.constant dense<0.000000e+00> : vector<8x16xf32>
    %7 = tpu.matmul %4, %6, %cst_8 {dimension_numbers = #tpu.dot_dimension_numbers<[1], [0], [0], [1], [0, 0, 1, 1], [], []>} : vector<8x8xbf16>, vector<8x16xbf16>, vector<8x16xf32> -> vector<8x16xf32>
    %8 = arith.addf %2, %7 : vector<8x16xf32>
    %c0_9 = arith.constant 0 : index
    %c1 = arith.constant 1 : index
    %c0_10 = arith.constant 0 : index
    %9 = vector.load %arg1[%c0_9, %c1, %c0_10] : memref<2x9x8xbf16, #tpu.memory_space<vmem>>, vector<1x8x8xbf16>
    %10 = vector.shape_cast %9 : vector<1x8x8xbf16> to vector<8x8xbf16>
    %c1_11 = arith.constant 1 : index
    %c0_12 = arith.constant 0 : index
    %c0_13 = arith.constant 0 : index
    %11 = vector.load %arg3[%c1_11, %c0_12, %c0_13] : memref<2x8x16xbf16, #tpu.memory_space<vmem>>, vector<1x8x16xbf16>
    %12 = vector.shape_cast %11 : vector<1x8x16xbf16> to vector<8x16xbf16>
    %cst_14 = arith.constant dense<0.000000e+00> : vector<8x16xf32>
    %13 = tpu.matmul %10, %12, %cst_14 {dimension_numbers = #tpu.dot_dimension_numbers<[1], [0], [0], [1], [0, 0, 1, 1], [], []>} : vector<8x8xbf16>, vector<8x16xbf16>, vector<8x16xf32> -> vector<8x16xf32>
    %14 = arith.addf %8, %13 : vector<8x16xf32>
    %c0_15 = arith.constant 0 : index
    %c0_16 = arith.constant 0 : index
    %15 = vector.load %arg6[%c0_15, %c0_16] : memref<1x16xf32, #tpu.memory_space<vmem>>, vector<1x16xf32>
    %16 = vector.broadcast %15 : vector<1x16xf32> to vector<8x16xf32>
    %17 = arith.mulf %14, %16 : vector<8x16xf32>
    %c0_17 = arith.constant 0 : index
    %c0_18 = arith.constant 0 : index
    %18 = vector.load %arg7[%c0_17, %c0_18] : memref<1x16xf32, #tpu.memory_space<vmem>>, vector<1x16xf32>
    %19 = vector.broadcast %18 : vector<1x16xf32> to vector<8x16xf32>
    %20 = arith.addf %17, %19 : vector<8x16xf32>
    %cst_19 = arith.constant 0.000000e+00 : f32
    %21 = vector.broadcast %cst_19 : f32 to vector<8x16xf32>
    %22 = arith.maximumf %20, %21 : vector<8x16xf32>
    %23 = arith.truncf %22 : vector<8x16xf32> to vector<8x16xbf16>
    %c1_20 = arith.constant 1 : index
    %c0_21 = arith.constant 0 : index
    %24 = vector.load %arg12[%c1_20, %c0_21] : memref<9x16xbf16, #tpu.memory_space<vmem>>, vector<8x16xbf16>
    tpu.vector_store %arg12[%c1_20, %c0_21], %23 {strides = array<i32>} : memref<9x16xbf16, #tpu.memory_space<vmem>>, vector<8x16xbf16>,
    %cst_22 = arith.constant 0.000000e+00 : f32
    %25 = vector.broadcast %cst_22 : f32 to vector<8x8xf32>
    %c0_23 = arith.constant 0 : index
    %c0_24 = arith.constant 0 : index
    %26 = vector.load %arg12[%c0_23, %c0_24] : memref<9x16xbf16, #tpu.memory_space<vmem>>, vector<8x16xbf16>
    %c0_25 = arith.constant 0 : index
    %c0_26 = arith.constant 0 : index
    %c0_27 = arith.constant 0 : index
    %27 = vector.load %arg4[%c0_25, %c0_26, %c0_27] : memref<2x16x8xbf16, #tpu.memory_space<vmem>>, vector<1x16x8xbf16>
    %28 = vector.shape_cast %27 : vector<1x16x8xbf16> to vector<16x8xbf16>
    %cst_28 = arith.constant dense<0.000000e+00> : vector<8x8xf32>
    %29 = tpu.matmul %26, %28, %cst_28 {dimension_numbers = #tpu.dot_dimension_numbers<[1], [0], [0], [1], [0, 0, 1, 1], [], []>} : vector<8x16xbf16>, vector<16x8xbf16>, vector<8x8xf32> -> vector<8x8xf32>
    %30 = arith.addf %25, %29 : vector<8x8xf32>
    %c1_29 = arith.constant 1 : index
    %c0_30 = arith.constant 0 : index
    %31 = vector.load %arg12[%c1_29, %c0_30] : memref<9x16xbf16, #tpu.memory_space<vmem>>, vector<8x16xbf16>
    %c1_31 = arith.constant 1 : index
    %c0_32 = arith.constant 0 : index
    %c0_33 = arith.constant 0 : index
    %32 = vector.load %arg4[%c1_31, %c0_32, %c0_33] : memref<2x16x8xbf16, #tpu.memory_space<vmem>>, vector<1x16x8xbf16>
    %33 = vector.shape_cast %32 : vector<1x16x8xbf16> to vector<16x8xbf16>
    %cst_34 = arith.constant dense<0.000000e+00> : vector<8x8xf32>
    %34 = tpu.matmul %31, %33, %cst_34 {dimension_numbers = #tpu.dot_dimension_numbers<[1], [0], [0], [1], [0, 0, 1, 1], [], []>} : vector<8x16xbf16>, vector<16x8xbf16>, vector<8x8xf32> -> vector<8x8xf32>
    %35 = arith.addf %30, %34 : vector<8x8xf32>
    %c0_35 = arith.constant 0 : index
    %c0_36 = arith.constant 0 : index
    %c0_37 = arith.constant 0 : index
    %36 = vector.load %arg2[%c0_35, %c0_36, %c0_37] : memref<2x8x4xbf16, #tpu.memory_space<vmem>>, vector<1x8x4xbf16>
    %37 = vector.shape_cast %36 : vector<1x8x4xbf16> to vector<8x4xbf16>
    %c0_38 = arith.constant 0 : index
    %c0_39 = arith.constant 0 : index
    %38 = vector.load %arg5[%c0_38, %c0_39] : memref<4x8xbf16, #tpu.memory_space<vmem>>, vector<4x8xbf16>
    %cst_40 = arith.constant dense<0.000000e+00> : vector<8x8xf32>
    %39 = tpu.matmul %37, %38, %cst_40 {dimension_numbers = #tpu.dot_dimension_numbers<[1], [0], [0], [1], [0, 0, 1, 1], [], []>} : vector<8x4xbf16>, vector<4x8xbf16>, vector<8x8xf32> -> vector<8x8xf32>
    %40 = arith.addf %35, %39 : vector<8x8xf32>
    %c0_41 = arith.constant 0 : index
    %c0_42 = arith.constant 0 : index
    %c0_43 = arith.constant 0 : index
    %41 = vector.load %arg11[%c0_41, %c0_42, %c0_43] : memref<2x8x8xf32, #tpu.memory_space<vmem>>, vector<1x8x8xf32>
    %42 = vector.shape_cast %41 : vector<1x8x8xf32> to vector<8x8xf32>
    %43 = vector.shape_cast %40 : vector<8x8xf32> to vector<1x8x8xf32>
    tpu.vector_store %arg11[%c0_41, %c0_42, %c0_43], %43 {strides = array<i32>} : memref<2x8x8xf32, #tpu.memory_space<vmem>>, vector<1x8x8xf32>,
    %c0_44 = arith.constant 0 : index
    %c0_45 = arith.constant 0 : index
    %44 = vector.load %arg8[%c0_44, %c0_45] : memref<1x8xf32, #tpu.memory_space<vmem>>, vector<1x8xf32>
    %45 = vector.broadcast %44 : vector<1x8xf32> to vector<8x8xf32>
    %46 = arith.mulf %40, %45 : vector<8x8xf32>
    %c0_46 = arith.constant 0 : index
    %c0_47 = arith.constant 0 : index
    %47 = vector.load %arg9[%c0_46, %c0_47] : memref<1x8xf32, #tpu.memory_space<vmem>>, vector<1x8xf32>
    %48 = vector.broadcast %47 : vector<1x8xf32> to vector<8x8xf32>
    %49 = arith.addf %46, %48 : vector<8x8xf32>
    %cst_48 = arith.constant 0.000000e+00 : f32
    %50 = vector.broadcast %cst_48 : f32 to vector<8x8xf32>
    %51 = arith.maximumf %49, %50 : vector<8x8xf32>
    %c0_49 = arith.constant 0 : index
    %c0_50 = arith.constant 0 : index
    %c0_51 = arith.constant 0 : index
    %52 = vector.load %arg10[%c0_49, %c0_50, %c0_51] : memref<2x8x8xf32, #tpu.memory_space<vmem>>, vector<1x8x8xf32>
    %53 = vector.shape_cast %52 : vector<1x8x8xf32> to vector<8x8xf32>
    %54 = vector.shape_cast %51 : vector<8x8xf32> to vector<1x8x8xf32>
    tpu.vector_store %arg10[%c0_49, %c0_50, %c0_51], %54 {strides = array<i32>} : memref<2x8x8xf32, #tpu.memory_space<vmem>>, vector<1x8x8xf32>,
    %cst_52 = arith.constant 0.000000e+00 : f32
    %55 = vector.broadcast %cst_52 : f32 to vector<8x16xf32>
    %c1_53 = arith.constant 1 : index
    %c0_54 = arith.constant 0 : index
    %c0_55 = arith.constant 0 : index
    %56 = vector.load %arg1[%c1_53, %c0_54, %c0_55] : memref<2x9x8xbf16, #tpu.memory_space<vmem>>, vector<1x8x8xbf16>
    %57 = vector.shape_cast %56 : vector<1x8x8xbf16> to vector<8x8xbf16>
    %c0_56 = arith.constant 0 : index
    %c0_57 = arith.constant 0 : index
    %c0_58 = arith.constant 0 : index
    %58 = vector.load %arg3[%c0_56, %c0_57, %c0_58] : memref<2x8x16xbf16, #tpu.memory_space<vmem>>, vector<1x8x16xbf16>
    %59 = vector.shape_cast %58 : vector<1x8x16xbf16> to vector<8x16xbf16>
    %cst_59 = arith.constant dense<0.000000e+00> : vector<8x16xf32>
    %60 = tpu.matmul %57, %59, %cst_59 {dimension_numbers = #tpu.dot_dimension_numbers<[1], [0], [0], [1], [0, 0, 1, 1], [], []>} : vector<8x8xbf16>, vector<8x16xbf16>, vector<8x16xf32> -> vector<8x16xf32>
    %61 = arith.addf %55, %60 : vector<8x16xf32>
    %c1_60 = arith.constant 1 : index
    %c1_61 = arith.constant 1 : index
    %c0_62 = arith.constant 0 : index
    %62 = vector.load %arg1[%c1_60, %c1_61, %c0_62] : memref<2x9x8xbf16, #tpu.memory_space<vmem>>, vector<1x8x8xbf16>
    %63 = vector.shape_cast %62 : vector<1x8x8xbf16> to vector<8x8xbf16>
    %c1_63 = arith.constant 1 : index
    %c0_64 = arith.constant 0 : index
    %c0_65 = arith.constant 0 : index
    %64 = vector.load %arg3[%c1_63, %c0_64, %c0_65] : memref<2x8x16xbf16, #tpu.memory_space<vmem>>, vector<1x8x16xbf16>
    %65 = vector.shape_cast %64 : vector<1x8x16xbf16> to vector<8x16xbf16>
    %cst_66 = arith.constant dense<0.000000e+00> : vector<8x16xf32>
    %66 = tpu.matmul %63, %65, %cst_66 {dimension_numbers = #tpu.dot_dimension_numbers<[1], [0], [0], [1], [0, 0, 1, 1], [], []>} : vector<8x8xbf16>, vector<8x16xbf16>, vector<8x16xf32> -> vector<8x16xf32>
    %67 = arith.addf %61, %66 : vector<8x16xf32>
    %c0_67 = arith.constant 0 : index
    %c0_68 = arith.constant 0 : index
    %68 = vector.load %arg6[%c0_67, %c0_68] : memref<1x16xf32, #tpu.memory_space<vmem>>, vector<1x16xf32>
    %69 = vector.broadcast %68 : vector<1x16xf32> to vector<8x16xf32>
    %70 = arith.mulf %67, %69 : vector<8x16xf32>
    %c0_69 = arith.constant 0 : index
    %c0_70 = arith.constant 0 : index
    %71 = vector.load %arg7[%c0_69, %c0_70] : memref<1x16xf32, #tpu.memory_space<vmem>>, vector<1x16xf32>
    %72 = vector.broadcast %71 : vector<1x16xf32> to vector<8x16xf32>
    %73 = arith.addf %70, %72 : vector<8x16xf32>
    %cst_71 = arith.constant 0.000000e+00 : f32
    %74 = vector.broadcast %cst_71 : f32 to vector<8x16xf32>
    %75 = arith.maximumf %73, %74 : vector<8x16xf32>
    %76 = arith.truncf %75 : vector<8x16xf32> to vector<8x16xbf16>
    %c1_72 = arith.constant 1 : index
    %c0_73 = arith.constant 0 : index
    %77 = vector.load %arg12[%c1_72, %c0_73] : memref<9x16xbf16, #tpu.memory_space<vmem>>, vector<8x16xbf16>
    tpu.vector_store %arg12[%c1_72, %c0_73], %76 {strides = array<i32>} : memref<9x16xbf16, #tpu.memory_space<vmem>>, vector<8x16xbf16>,
    %cst_74 = arith.constant 0.000000e+00 : f32
    %78 = vector.broadcast %cst_74 : f32 to vector<8x8xf32>
    %c0_75 = arith.constant 0 : index
    %c0_76 = arith.constant 0 : index
    %79 = vector.load %arg12[%c0_75, %c0_76] : memref<9x16xbf16, #tpu.memory_space<vmem>>, vector<8x16xbf16>
    %c0_77 = arith.constant 0 : index
    %c0_78 = arith.constant 0 : index
    %c0_79 = arith.constant 0 : index
    %80 = vector.load %arg4[%c0_77, %c0_78, %c0_79] : memref<2x16x8xbf16, #tpu.memory_space<vmem>>, vector<1x16x8xbf16>
    %81 = vector.shape_cast %80 : vector<1x16x8xbf16> to vector<16x8xbf16>
    %cst_80 = arith.constant dense<0.000000e+00> : vector<8x8xf32>
    %82 = tpu.matmul %79, %81, %cst_80 {dimension_numbers = #tpu.dot_dimension_numbers<[1], [0], [0], [1], [0, 0, 1, 1], [], []>} : vector<8x16xbf16>, vector<16x8xbf16>, vector<8x8xf32> -> vector<8x8xf32>
    %83 = arith.addf %78, %82 : vector<8x8xf32>
    %c1_81 = arith.constant 1 : index
    %c0_82 = arith.constant 0 : index
    %84 = vector.load %arg12[%c1_81, %c0_82] : memref<9x16xbf16, #tpu.memory_space<vmem>>, vector<8x16xbf16>
    %c1_83 = arith.constant 1 : index
    %c0_84 = arith.constant 0 : index
    %c0_85 = arith.constant 0 : index
    %85 = vector.load %arg4[%c1_83, %c0_84, %c0_85] : memref<2x16x8xbf16, #tpu.memory_space<vmem>>, vector<1x16x8xbf16>
    %86 = vector.shape_cast %85 : vector<1x16x8xbf16> to vector<16x8xbf16>
    %cst_86 = arith.constant dense<0.000000e+00> : vector<8x8xf32>
    %87 = tpu.matmul %84, %86, %cst_86 {dimension_numbers = #tpu.dot_dimension_numbers<[1], [0], [0], [1], [0, 0, 1, 1], [], []>} : vector<8x16xbf16>, vector<16x8xbf16>, vector<8x8xf32> -> vector<8x8xf32>
    %88 = arith.addf %83, %87 : vector<8x8xf32>
    %c1_87 = arith.constant 1 : index
    %c0_88 = arith.constant 0 : index
    %c0_89 = arith.constant 0 : index
    %89 = vector.load %arg2[%c1_87, %c0_88, %c0_89] : memref<2x8x4xbf16, #tpu.memory_space<vmem>>, vector<1x8x4xbf16>
    %90 = vector.shape_cast %89 : vector<1x8x4xbf16> to vector<8x4xbf16>
    %c0_90 = arith.constant 0 : index
    %c0_91 = arith.constant 0 : index
    %91 = vector.load %arg5[%c0_90, %c0_91] : memref<4x8xbf16, #tpu.memory_space<vmem>>, vector<4x8xbf16>
    %cst_92 = arith.constant dense<0.000000e+00> : vector<8x8xf32>
    %92 = tpu.matmul %90, %91, %cst_92 {dimension_numbers = #tpu.dot_dimension_numbers<[1], [0], [0], [1], [0, 0, 1, 1], [], []>} : vector<8x4xbf16>, vector<4x8xbf16>, vector<8x8xf32> -> vector<8x8xf32>
    %93 = arith.addf %88, %92 : vector<8x8xf32>
    %c1_93 = arith.constant 1 : index
    %c0_94 = arith.constant 0 : index
    %c0_95 = arith.constant 0 : index
    %94 = vector.load %arg11[%c1_93, %c0_94, %c0_95] : memref<2x8x8xf32, #tpu.memory_space<vmem>>, vector<1x8x8xf32>
    %95 = vector.shape_cast %94 : vector<1x8x8xf32> to vector<8x8xf32>
    %96 = vector.shape_cast %93 : vector<8x8xf32> to vector<1x8x8xf32>
    tpu.vector_store %arg11[%c1_93, %c0_94, %c0_95], %96 {strides = array<i32>} : memref<2x8x8xf32, #tpu.memory_space<vmem>>, vector<1x8x8xf32>,
    %c0_96 = arith.constant 0 : index
    %c0_97 = arith.constant 0 : index
    %97 = vector.load %arg8[%c0_96, %c0_97] : memref<1x8xf32, #tpu.memory_space<vmem>>, vector<1x8xf32>
    %98 = vector.broadcast %97 : vector<1x8xf32> to vector<8x8xf32>
    %99 = arith.mulf %93, %98 : vector<8x8xf32>
    %c0_98 = arith.constant 0 : index
    %c0_99 = arith.constant 0 : index
    %100 = vector.load %arg9[%c0_98, %c0_99] : memref<1x8xf32, #tpu.memory_space<vmem>>, vector<1x8xf32>
    %101 = vector.broadcast %100 : vector<1x8xf32> to vector<8x8xf32>
    %102 = arith.addf %99, %101 : vector<8x8xf32>
    %cst_100 = arith.constant 0.000000e+00 : f32
    %103 = vector.broadcast %cst_100 : f32 to vector<8x8xf32>
    %104 = arith.maximumf %102, %103 : vector<8x8xf32>
    %c1_101 = arith.constant 1 : index
    %c0_102 = arith.constant 0 : index
    %c0_103 = arith.constant 0 : index
    %105 = vector.load %arg10[%c1_101, %c0_102, %c0_103] : memref<2x8x8xf32, #tpu.memory_space<vmem>>, vector<1x8x8xf32>
    %106 = vector.shape_cast %105 : vector<1x8x8xf32> to vector<8x8xf32>
    %107 = vector.shape_cast %104 : vector<8x8xf32> to vector<1x8x8xf32>
    tpu.vector_store %arg10[%c1_101, %c0_102, %c0_103], %107 {strides = array<i32>} : memref<2x8x8xf32, #tpu.memory_space<vmem>>, vector<1x8x8xf32>,
    return
  }
  func.func @transform_0(%arg0: i32) -> (i32, i32, i32) {
    %c0_i32 = arith.constant 0 : i32
    %c0_i32_0 = arith.constant 0 : i32
    %c0_i32_1 = arith.constant 0 : i32
    return %arg0, %c0_i32, %c0_i32_0 : i32, i32, i32
  }
  func.func @transform_1(%arg0: i32) -> (i32, i32, i32) {
    %c0_i32 = arith.constant 0 : i32
    %c0_i32_0 = arith.constant 0 : i32
    %c0_i32_1 = arith.constant 0 : i32
    return %arg0, %c0_i32, %c0_i32_0 : i32, i32, i32
  }
  func.func @transform_2(%arg0: i32) -> (i32, i32, i32) {
    %c0_i32 = arith.constant 0 : i32
    %c0_i32_0 = arith.constant 0 : i32
    %c0_i32_1 = arith.constant 0 : i32
    %c0_i32_2 = arith.constant 0 : i32
    return %c0_i32, %c0_i32_0, %c0_i32_1 : i32, i32, i32
  }
  func.func @transform_3(%arg0: i32) -> (i32, i32, i32) {
    %c0_i32 = arith.constant 0 : i32
    %c0_i32_0 = arith.constant 0 : i32
    %c0_i32_1 = arith.constant 0 : i32
    %c0_i32_2 = arith.constant 0 : i32
    return %c0_i32, %c0_i32_0, %c0_i32_1 : i32, i32, i32
  }
  func.func @transform_4(%arg0: i32) -> (i32, i32) {
    %c0_i32 = arith.constant 0 : i32
    %c0_i32_0 = arith.constant 0 : i32
    %c0_i32_1 = arith.constant 0 : i32
    return %c0_i32, %c0_i32_0 : i32, i32
  }
  func.func @transform_5(%arg0: i32) -> (i32, i32) {
    %c0_i32 = arith.constant 0 : i32
    %c0_i32_0 = arith.constant 0 : i32
    %c0_i32_1 = arith.constant 0 : i32
    return %c0_i32, %c0_i32_0 : i32, i32
  }
  func.func @transform_6(%arg0: i32) -> (i32, i32) {
    %c0_i32 = arith.constant 0 : i32
    %c0_i32_0 = arith.constant 0 : i32
    %c0_i32_1 = arith.constant 0 : i32
    return %c0_i32, %c0_i32_0 : i32, i32
  }
  func.func @transform_7(%arg0: i32) -> (i32, i32) {
    %c0_i32 = arith.constant 0 : i32
    %c0_i32_0 = arith.constant 0 : i32
    %c0_i32_1 = arith.constant 0 : i32
    return %c0_i32, %c0_i32_0 : i32, i32
  }
  func.func @transform_8(%arg0: i32) -> (i32, i32) {
    %c0_i32 = arith.constant 0 : i32
    %c0_i32_0 = arith.constant 0 : i32
    %c0_i32_1 = arith.constant 0 : i32
    return %c0_i32, %c0_i32_0 : i32, i32
  }
  func.func @transform_9(%arg0: i32) -> (i32, i32, i32) {
    %c0_i32 = arith.constant 0 : i32
    %c0_i32_0 = arith.constant 0 : i32
    %c0_i32_1 = arith.constant 0 : i32
    return %arg0, %c0_i32, %c0_i32_0 : i32, i32, i32
  }
  func.func @transform_10(%arg0: i32) -> (i32, i32, i32) {
    %c0_i32 = arith.constant 0 : i32
    %c0_i32_0 = arith.constant 0 : i32
    %c0_i32_1 = arith.constant 0 : i32
    return %arg0, %c0_i32, %c0_i32_0 : i32, i32, i32
  }
}

</mosaic_0001>

<bundles_post_ra>
// kernel: tpu_custom_call.1
= control target key start
LH: loop header
LB: loop body
LE: loop exit
PB: predicated region body
PF: predicated region fallthrough
CT: control target
= control target key end

     0   :  { %16 = vsyncpa [#allocation4], 0  ;;  %vm64_vm0 = vcmask 1043456   ;;  %v924_v1 = vmov 0.0   ;;  %vm925_vm1 = vmmov 0   ;;  %vm60_vm2 = vcmask 64512   ;;  %s1131_s0 = inlined_call_operand.vmem [shape: bf16[2,9,8], index: 0, kind: input, shape index: {}]   ;;  %s1132_s1 = inlined_call_operand.vmem [shape: bf16[2,8,4], index: 1, kind: input, shape index: {}]   ;;  %s1133_s2 = inlined_call_operand.vmem [shape: bf16[2,8,16], index: 2, kind: input, shape index: {}]   ;;  %s1134_s3 = inlined_call_operand.vmem [shape: bf16[2,16,8], index: 3, kind: input, shape index: {}]   ;;  %s1135_s4 = inlined_call_operand.vmem [shape: bf16[4,8], index: 4, kind: input, shape index: {}]   ;;  %s1136_s5 = inlined_call_operand.vmem [shape: f32[1,16], index: 5, kind: input, shape index: {}]   ;;  %s1137_s6 = inlined_call_operand.vmem [shape: f32[1,16], index: 6, kind: input, shape index: {}]   ;;  %s1138_s7 = inlined_call_operand.vmem [shape: f32[1,8], index: 7, kind: input, shape index: {}]   ;;  %s1139_s8 = inlined_call_operand.vmem [shape: f32[1,8], index: 8, kind: input, shape index: {}]   ;;  %s1140_s9 = inlined_call_operand.hbm [shape: f32[2,8,8], index: 9, kind: output, shape index: {0}]   ;;  %s1141_s10 = inlined_call_operand.hbm [shape: f32[2,8,8], index: 10, kind: output, shape index: {1}]  }
   0x1   :  { %v44_v0 = vld [vmem:[%s1133_s2] sm:$0xf]  ;;  %812 = vmatprep.subr.bf16.mxu1 %v924_v1  ;;  %814 = vmatprep.mubr.msk.bf16.mxu1 %vm925_vm1, %v924_v1  ;;  %v45_v4 = vld [vmem:[%s1131_s0 + $0x4] sm:$0x1] }
   0x2   :  { %v112_v2 = vsel %vm64_vm0, %v44_v0, 0  ;;  %v43_v3 = vld [vmem:[%s1131_s0] sm:$0xf]  ;;  %806 = vmatprep.subr.bf16.mxu0 %v924_v1  ;;  %v747_v6 = vld [vmem:[%s1133_s2 + $0x4] sm:$0xf]  ;;  %808 = vmatprep.mubr.msk.bf16.mxu0 %vm925_vm1, %v924_v1 }
   0x3   :  { %813 = vmatpush3.bf16.msra.mxu1 %v112_v2  ;;  %v748_v5 = vcombine.low %v43_v3, %v45_v4  ;;  %v66_v7 = vsel %vm64_vm0, %v747_v6, 0 }
   0x4   :  { %824 = vmatprep.subr.bf16.mxu1 %v924_v1  ;;  %807 = vmatpush3.bf16.msra.mxu0 %v66_v7 }
   0x5   :  { %v54_v8 = vshrl.u32 %v748_v5, 16  ;;  %v56_v9 = vshll.u32 %v748_v5, 16  ;;  %818 = vmatprep.subr.bf16.mxu0 %v924_v1 }
   0x6   :  { %815 = vmatmul.mubr.msk.bf16.vlgmr.msra.gmra.mxu1 %vm60_vm2, %v43_v3 }
   0x7   :  { %17 = vsyncpa [#allocation6], 0  ;;  %v58_v10 = vrot.slane %v56_v9, 1  ;;  %826 = vmatprep.mubr.msk.bf16.mxu1 %vm925_vm1, %v924_v1  ;;  %vm37_vm3 = vcmask 122880   ;;  %vm38_vm4 = vsmask.f32 256 }
   0x8   :  { %v40_v12 = vld [vmem:[#allocation2] sm:$0x1]  ;;  %vm1013_vm5 = vmand %vm37_vm3, %vm38_vm4  ;;  %v874_v16 = vld [vmem:[%s1134_s3 + $0x8] sm:$0xff]   ;;  %vm185_vm6 = vcmask 125952   ;;  %vm186_vm7 = vsmask.f32 7938 }
   0x9   :  { %v59_v11 = vor.u32 %v58_v10, %v54_v8  ;;  %v41_v14 = vsel %vm1013_vm5, 0, %v40_v12  ;;  %v873_v15 = vld [vmem:[%s1134_s3] sm:$0xff]   ;;  %vm1039_vm8 = vmand %vm185_vm6, %vm186_vm7  ;;  %v764_v40 = vld [vmem:[%s1131_s0 + $0x8] sm:$0xf]  ;;  %vm219_vm9 = vcmask 130048   ;;  %vm318_vm10 = vcmask 1041408  }
   0xa   :  { %42 = vst [vmem:[#allocation2] sm:$0x1] %v41_v14  ;;  %825 = vmatpush3.bf16.msra.mxu1 %v873_v15  ;;  %v1030_v21 = vld [vmem:[%s1136_s5] ss:$0 sm:$0xff]  ;;  %v191_v37 = vld [vmem:[#allocation2 + $0x4] sm:$0x1] }
   0xb   :  { %809 = vmatmul.mubr.msk.bf16.vlgmr.msra.gmra.mxu0 %vm60_vm2, %v59_v11  ;;  %836 = vmatprep.subr.bf16.mxu1 %v924_v1  ;;  %v1035_v24 = vld [vmem:[%s1137_s6] ss:$0 sm:$0xff]  ;;  %v765_v41 = vld [vmem:[%s1131_s0 + $0xc] sm:$0x1]  ;;  %v766_v45 = vld [vmem:[%s1133_s2 + $0x4] sm:$0xf] }
   0xc   :  { %820 = vmatprep.mubr.msk.bf16.mxu0 %vm925_vm1, %v924_v1  ;;  %819 = vmatpush3.bf16.msra.mxu0 %v874_v16  ;;  %v767_v44 = vcombine.low %v764_v40, %v765_v41  ;;  %v403_v47 = vsel %vm64_vm0, %v766_v45, 0  ;;  %v313_v54 = vld [vmem:[%s1135_s4] sm:$0x3]  ;;  %vm314_vm11 = vcmask 31744   ;;  %v878_v0 = vld [vmem:[%s1134_s3 + $0x8] sm:$0xff]  }
   0xd   :  { %830 = vmatprep.subr.bf16.mxu0 %v924_v1  ;;  %v320_v59 = vsel %vm318_vm10, %v313_v54, 0  ;;  %v384_v60 = vld [vmem:[%s1133_s2] sm:$0xf]  ;;  %v780_v13 = vld [vmem:[%s1132_s1 + $0x4] sm:$0xf] }
   0xe   :  { %v395_v46 = vshll.u32 %v767_v44, 16  ;;  %v393_v51 = vshrl.u32 %v767_v44, 16  ;;  %v312_v61 = vld [vmem:[%s1132_s1] sm:$0xf]  ;;  %v449_v62 = vsel %vm64_vm0, %v384_v60, 0  ;;  %s927_s1 = smov [#allocation3]  }
   0xf   :  { %v877_v63 = vld [vmem:[%s1134_s3] sm:$0xff]   ;;  %s720_s27 = sshll.u32 %s927_s1, 4  ;;  %s721_s27 = int_to_ptr.vmem [resolvable:$true] %s720_s27 }
  0x10   :  { %v397_v52 = vrot.slane %v395_v46, 1 }
  0x11   :  { %v188_v36 = vld [vmem:[#allocation2] sm:$0xf] }
  0x12   :  { %v398_v57 = vor.u32 %v397_v52, %v393_v51 }
  0xc6   :  { %v148_v17 = vpop.f32.mrf.mxu1 }
  0xc8   :  { %v816_v18 = vpop.f32.mrf.mxu1 }
  0xca   :  { %v151_v19 = vpop.f32.mrf.mxu1 }
  0xcb   :  { %v102_v20 = vpop.f32.mrf.mxu0  ;;  %v1099_v19 = vld [vmem:[%s1139_s8] ss:$0 sm:$0xff] }
  0xcc   :  { %v149_v22 = vadd.f32 %v148_v17, %v102_v20  ;;  %v817_v23 = vpop.f32.mrf.mxu1  ;;  %v762_v17 = vld [vmem:[%s1138_s7] ss:$0 sm:$0xff] }
  0xcd   :  { %v810_v25 = vpop.f32.mrf.mxu0 }
  0xce   :  { %v161_v26 = vmul.f32 %v1030_v21, %v149_v22 }
  0xcf   :  { %v105_v27 = vpop.f32.mrf.mxu0 }
  0xd0   :  { %v169_v28 = vadd.f32 %v1035_v24, %v161_v26 }
  0xd1   :  { %v811_v29 = vpop.f32.mrf.mxu0 }
  0xd2   :  { %v170_v30 = vmax.f32 %v169_v28, 0.0 }
  0xd4   :  { %v784_v31 = vpack.c.bf16 %v170_v30, %v170_v30 }
  0xd6   :  { %v176_v32 = vshrl.u32 %v784_v31, 16  ;;  %v179_v34 = vshll.u32 %v784_v31, 16 }
  0xd8   :  { %v178_v33 = vrot.slane %v176_v32, 7 }
  0xda   :  { %v181_v38 = vor.u32 %v179_v34, %v178_v33  ;;  %v182_v39 = vrot.slane %v178_v33, 4 }
  0xdc   :  { %v189_v42 = vsel %vm1039_vm8, %v181_v38, %v188_v36  ;;  %v192_v43 = vsel %vm1013_vm5, %v182_v39, %v191_v37 }
  0xdd   :  { %190 = vst [vmem:[#allocation2] sm:$0xf] %v189_v42  ;;  %193 = vst [vmem:[#allocation2 + $0x4] sm:$0x1] %v192_v43 }
  0xe4   :  { %v194_v48 = vld [vmem:[#allocation2] sm:$0xf]  ;;  %v197_v49 = vld [vmem:[#allocation2 + $0x4] sm:$0x1] }
  0xe5   :  { %v756_v50 = vcombine.low %v194_v48, %v197_v49  ;;  %827 = vmatmul.mubr.msk.bf16.vlgmr.msra.gmra.mxu1 %vm219_vm9, %v194_v48  ;;  %v522_v43 = vld [vmem:[#allocation2] sm:$0xf]  ;;  %v525_v44 = vld [vmem:[#allocation2 + $0x4] sm:$0x1] }
  0xe6   :  { %837 = vmatpush3.bf16.msra.mxu1 %v403_v47  ;;  %838 = vmatprep.mubr.msk.bf16.mxu1 %vm925_vm1, %v924_v1  ;;  %v646_v49 = vld [vmem:[%s1135_s4] sm:$0x3]  ;;  %s926_s4 = smov [#allocation5]  }
  0xe7   :  { %v209_v53 = vshll.u32 %v756_v50, 16  ;;  %848 = vmatprep.subr.bf16.mxu1 %v924_v1  ;;  %v207_v55 = vshrl.u32 %v756_v50, 16  ;;  %v651_v35 = vsel %vm318_vm10, %v646_v49, 0  ;;  %s732_s26 = sshll.u32 %s926_s4, 4  ;;  %s733_s26 = int_to_ptr.vmem [resolvable:$true] %s732_s26 }
  0xe8   :  { %s880_s28 = scalar_lea.vmem %s733_s26, 256  ;;  %p885_p1 = scmp.lt.s32.totalorder %s733_s26, %s733_s26 }
  0xe9   :  { %v211_v56 = vrot.slane %v209_v53, 1  ;;  %p881_p0 = scmp.ne.s32.totalorder %s733_s26, %s880_s28  ;;  %p886_p2 = scmp.lt.s32.totalorder %s880_s28, %s880_s28 }
  0xeb   :  { %v212_v58 = vor.u32 %v211_v56, %v207_v55  ;;  %p887_p3 = por %p886_p2, %p885_p1 }
  0xed   :  { %821 = vmatmul.mubr.msk.bf16.vlgmr.msra.gmra.mxu0 %vm219_vm9, %v212_v58  ;;  %839 = vmatmul.mubr.msk.bf16.vlgmr.msra.gmra.mxu1 %vm60_vm2, %v398_v57  ;;  %p888_p4 = pnand %p887_p3, %p881_p0 }
  0xee   :  { %831 = vmatpush3.bf16.msra.mxu0 %v320_v59  ;;  %832 = vmatprep.mubr.msk.bf16.mxu0 %vm925_vm1, %v924_v1 }
  0xef   :  { %842 = vmatprep.subr.bf16.mxu0 %v924_v1  ;;  %850 = vmatprep.mubr.msk.bf16.mxu1 %vm925_vm1, %v924_v1 }
  0xf0   :  { %849 = vmatpush3.bf16.msra.mxu1 %v878_v0 }
  0xf1   :  { %860 = vmatprep.subr.bf16.mxu1 %v924_v1 }
  0xf5   :  { %833 = vmatmul.mubr.msk.bf16.vlgmr.msra.gmra.mxu0 %vm314_vm11, %v312_v61 }
  0xf6   :  { %843 = vmatpush3.bf16.msra.mxu0 %v449_v62  ;;  %844 = vmatprep.mubr.msk.bf16.mxu0 %vm925_vm1, %v924_v1 }
  0xf7   :  { %854 = vmatprep.subr.bf16.mxu0 %v924_v1 }
  0xfd   :  { %845 = vmatmul.mubr.msk.bf16.vlgmr.msra.gmra.mxu0 %vm60_vm2, %v764_v40 }
  0xfe   :  { %856 = vmatprep.mubr.msk.bf16.mxu0 %vm925_vm1, %v924_v1  ;;  %855 = vmatpush3.bf16.msra.mxu0 %v877_v63 }
 0x1a5   :  { %v306_v2 = vpop.f32.mrf.mxu1 }
 0x1a7   :  { %v828_v3 = vpop.f32.mrf.mxu1 }
 0x1a9   :  { %v309_v4 = vpop.f32.mrf.mxu1 }
 0x1ab   :  { %v829_v5 = vpop.f32.mrf.mxu1 }
 0x1ad   :  { %v257_v6 = vpop.f32.mrf.mxu0  ;;  %v439_v7 = vpop.f32.mrf.mxu1 }
 0x1ae   :  { %v307_v15 = vadd.f32 %v306_v2, %v257_v6 }
 0x1af   :  { %v822_v8 = vpop.f32.mrf.mxu0  ;;  %v840_v9 = vpop.f32.mrf.mxu1 }
 0x1b1   :  { %v260_v10 = vpop.f32.mrf.mxu0  ;;  %v442_v11 = vpop.f32.mrf.mxu1 }
 0x1b3   :  { %v823_v12 = vpop.f32.mrf.mxu0  ;;  %v841_v14 = vpop.f32.mrf.mxu1 }
 0x1b5   :  { %v356_v16 = vpop.f32.mrf.mxu0 }
 0x1b6   :  { %v362_v18 = vadd.f32 %v356_v16, %v307_v15 }
 0x1b7   :  { %v834_v20 = vpop.f32.mrf.mxu0 }
 0x1b8   :  { %363 = vst.msk [vmem:[#allocation5] sm:$0xff] %vm60_vm2, %v362_v18  ;;  %v371_v22 = vmul.f32 %v762_v17, %v362_v18 }
 0x1b9   :  { %v359_v23 = vpop.f32.mrf.mxu0 }
 0x1ba   :  { %v379_v25 = vadd.f32 %v1099_v19, %v371_v22 }
 0x1bb   :  { %v835_v26 = vpop.f32.mrf.mxu0 }
 0x1bc   :  { %v380_v27 = vmax.f32 %v379_v25, 0.0 }
 0x1bd   :  { %v485_v28 = vpop.f32.mrf.mxu0 }
 0x1be   :  { %381 = vst.msk [vmem:[#allocation3] sm:$0xff] %vm60_vm2, %v380_v27  ;;  %v486_v29 = vadd.f32 %v485_v28, %v439_v7 }
 0x1bf   :  { %v846_v30 = vpop.f32.mrf.mxu0 }
 0x1c0   :  { %v498_v31 = vmul.f32 %v1030_v21, %v486_v29 }
 0x1c1   :  { %v488_v32 = vpop.f32.mrf.mxu0 }
 0x1c2   :  { %v506_v33 = vadd.f32 %v1035_v24, %v498_v31 }
 0x1c3   :  { %v847_v34 = vpop.f32.mrf.mxu0 }
 0x1c4   :  { %v507_v36 = vmax.f32 %v506_v33, 0.0 }
 0x1c6   :  { %v785_v37 = vpack.c.bf16 %v507_v36, %v507_v36 }
 0x1c8   :  { %v513_v38 = vshrl.u32 %v785_v37, 16  ;;  %v516_v40 = vshll.u32 %v785_v37, 16 }
 0x1ca   :  { %v515_v39 = vrot.slane %v513_v38, 7 }
 0x1cc   :  { %v518_v41 = vor.u32 %v516_v40, %v515_v39  ;;  %v519_v42 = vrot.slane %v515_v39, 4 }
 0x1ce   :  { %v523_v45 = vsel %vm1039_vm8, %v518_v41, %v522_v43  ;;  %v526_v46 = vsel %vm1013_vm5, %v519_v42, %v525_v44 }
 0x1cf   :  { %524 = vst [vmem:[#allocation2] sm:$0xf] %v523_v45  ;;  %527 = vst [vmem:[#allocation2 + $0x4] sm:$0x1] %v526_v46 }
 0x1d6   :  { %v528_v21 = vld [vmem:[#allocation2] sm:$0xf]  ;;  %v531_v24 = vld [vmem:[#allocation2 + $0x4] sm:$0x1] }
 0x1d7   :  { %v775_v47 = vcombine.low %v528_v21, %v531_v24  ;;  %857 = vmatmul.mubr.msk.bf16.vlgmr.msra.gmra.mxu0 %vm219_vm9, %v528_v21 }
 0x1d9   :  { %v542_v48 = vshll.u32 %v775_v47, 16  ;;  %v540_v50 = vshrl.u32 %v775_v47, 16 }
 0x1db   :  { %v544_v51 = vrot.slane %v542_v48, 1 }
 0x1dd   :  { %v545_v52 = vor.u32 %v544_v51, %v540_v50 }
 0x1df   :  { %851 = vmatmul.mubr.msk.bf16.vlgmr.msra.gmra.mxu1 %vm219_vm9, %v545_v52 }
 0x1e0   :  { %861 = vmatpush3.bf16.msra.mxu1 %v651_v35  ;;  %862 = vmatprep.mubr.msk.bf16.mxu1 %vm925_vm1, %v924_v1 }
 0x1e7   :  { %863 = vmatmul.mubr.msk.bf16.vlgmr.msra.gmra.mxu1 %vm314_vm11, %v780_v13 }
 0x297   :  { %v638_v53 = vpop.f32.mrf.mxu0 }
 0x299   :  { %v858_v54 = vpop.f32.mrf.mxu0 }
 0x29b   :  { %v641_v55 = vpop.f32.mrf.mxu0 }
 0x29d   :  { %v859_v56 = vpop.f32.mrf.mxu0 }
 0x29f   :  { %v589_v57 = vpop.f32.mrf.mxu1 }
 0x2a0   :  { %v639_v61 = vadd.f32 %v638_v53, %v589_v57 }
 0x2a1   :  { %v852_v58 = vpop.f32.mrf.mxu1 }
 0x2a3   :  { %v592_v59 = vpop.f32.mrf.mxu1 }
 0x2a5   :  { %v853_v60 = vpop.f32.mrf.mxu1 }
 0x2a7   :  { %v687_v62 = vpop.f32.mrf.mxu1 }
 0x2a8   :  { %v693_v63 = vadd.f32 %v687_v62, %v639_v61 }
 0x2a9   :  { %v864_v1 = vpop.f32.mrf.mxu1 }
 0x2aa   :  { %695 = vst.msk [vmem:[#allocation5 + $0x8] sm:$0xff] %vm60_vm2, %v693_v63  ;;  %v703_v0 = vmul.f32 %v762_v17, %v693_v63 }
 0x2ab   :  { %v690_v2 = vpop.f32.mrf.mxu1 }
 0x2ac   :  { %891 = shalt.err (!%p888_p4)
}
 0x2ad   :  { %s928_s5 = smov 128   ;;  %s929_s6 = smov 8   ;;  %v711_v3 = vadd.f32 %v1099_v19, %v703_v0  ;;  %v865_v4 = vpop.f32.mrf.mxu1 }
 0x2ae   :  { %738 = dma.vmem_to_hbm [thread:$0]  %s733_s26, 256, %s1141_s10, [#allocation6], %s928_s5, %s928_s5, %s929_s6  }
 0x2af   :  { %v712_v5 = vmax.f32 %v711_v3, 0.0  ;;  %s900_s11 = scalar_lea.vmem %s721_s27, 256  ;;  %p905_p6 = scmp.lt.s32.totalorder %s721_s27, %s721_s27 }
 0x2b0   :  { %p901_p5 = scmp.ne.s32.totalorder %s721_s27, %s900_s11  ;;  %p906_p7 = scmp.lt.s32.totalorder %s900_s11, %s900_s11 }
 0x2b1   :  { %714 = vst.msk [vmem:[#allocation3 + $0x8] sm:$0xff] %vm60_vm2, %v712_v5 }
 0x2b2   :  { %p907_p8 = por %p906_p7, %p905_p6 }
 0x2b4   :  { %p908_p9 = pnand %p907_p8, %p901_p5 }
 0x2b6   :  { %911 = shalt.err (!%p908_p9)
}
 0x2b7   :  { %726 = dma.vmem_to_hbm [thread:$0]  %s721_s27, 256, %s1140_s9, [#allocation4], %s928_s5, %s928_s5, %s929_s6  }
 0x2b8   :  { %920 = dma.done.wait [#allocation4], 256  }
 0x2b9   :  { %921 = vsyncadd [#allocation4], 4294967040 }
 0x2ba   :  { %922 = dma.done.wait [#allocation6], 256  }
 0x2bb   :  { %923 = vsyncadd [#allocation6], 4294967040 }
 0x2bc   :  { %745 = vsyncpa [#allocation4], 1 }
 0x2bd   :  { %746 = vsyncpa [#allocation6], 1 }

</bundles_post_ra>
